<compile_context>
chip_gen: v5e
topology: v5e:2x2
jax: 0.10.0
libtpu: 0.0.40
codegen_flags: <defaults>
</compile_context>

<pallas_src>
import functools

import jax
import jax.numpy as jnp
from jax import lax
from jax.experimental import pallas as pl
from jax.experimental.pallas import tpu as pltpu


def _residual_dw3x3_kernel(x_ref, p_ref, o_ref, xp_ref, *, th, c, wc, pad):
    """One (batch, H-tile) grid step.

    x_ref  : (1, H, W*C)            full image, resident across the H-tile axis
    p_ref  : (10, W*C)              rows 0..8: folded taps (scale*w, +1 at the
                                    center tap), tiled across W; row 9: BN bias
    o_ref  : (1, TH, W*C)           output row tile
    xp_ref : (TH+2, pad+W*C+pad)    f32 scratch: zero-padded input row slab
    """
    i = pl.program_id(1)
    nh = pl.num_programs(1)
    r0 = pl.multiple_of(i * th, th)

    # ---- build the zero-padded slab for this row tile entirely in VMEM ----
    xp_ref[...] = jnp.zeros_like(xp_ref)
    xp_ref[1:th + 1, pad:pad + wc] = (
        x_ref[0, pl.ds(r0, th), :].astype(jnp.float32))

    @pl.when(i > 0)
    def _():  # top halo row (global row r0 - 1)
        xp_ref[0:1, pad:pad + wc] = (
            x_ref[0, pl.ds(r0 - 1, 1), :].astype(jnp.float32))

    @pl.when(i < nh - 1)
    def _():  # bottom halo row (global row r0 + th)
        xp_ref[th + 1:th + 2, pad:pad + wc] = (
            x_ref[0, pl.ds(r0 + th, 1), :].astype(jnp.float32))

    # ---- 9 folded taps: BN scale + residual identity already live in the
    #      weights, zero padding lives in the slab -> 9 multiply-adds + bias ----
    acc = jnp.zeros((th, wc), jnp.float32)
    for dh in range(3):
        slab = xp_ref[dh:dh + th, :]                        # (th, pad+wc+pad)
        for dw in range(3):
            s = pad + (dw - 1) * c                          # lane offset of tap
            tap = p_ref[3 * dh + dw:3 * dh + dw + 1, :]     # (1, wc)
            acc = acc + slab[:, s:s + wc] * tap

    o_ref[0] = (acc + p_ref[9:10, :]).astype(o_ref.dtype)


def residual_dwconv_bn(x_nhwc, w_dw, bn_gamma, bn_beta, bn_mean, bn_var,
                       eps=1e-5):
    """y = x + BN(depthwise_conv3x3(x)).  x_nhwc: (N, H, W, C); w_dw: (3, 3, C)."""
    N, H, W, C = x_nhwc.shape
    wc = W * C
    if wc % 128 != 0:
        raise NotImplementedError("lane-dense path needs W*C % 128 == 0")

    # ---- parameter folding (glue, not hot path) ----
    scale = bn_gamma / jnp.sqrt(bn_var + eps)               # (C,)
    bias = bn_beta - bn_mean * scale                        # (C,)
    w_fold = w_dw.astype(jnp.float32) * scale[None, None, :]
    w_fold = w_fold.at[1, 1, :].add(1.0)                    # residual -> center tap
    taps = jnp.tile(w_fold.reshape(9, C), (1, W))           # (9, W*C)
    bias_t = jnp.tile(bias.reshape(1, C), (1, W))           # (1, W*C)
    params = jnp.concatenate([taps, bias_t], axis=0).astype(jnp.float32)

    # ---- lane-dense view: (N, H, W, C) -> (N, H, W*C), pure metadata reshape ----
    x2 = x_nhwc.reshape(N, H, wc)

    th = 8 if H % 8 == 0 else H                             # row-tile height
    pad = ((C + 127) // 128) * 128                          # 128-aligned side pad

    kernel = functools.partial(
        _residual_dw3x3_kernel, th=th, c=C, wc=wc, pad=pad)

    flops = 20 * N * H * W * C                              # 9 FMAs + bias
    bytes_accessed = int(2 * x2.size * x2.dtype.itemsize + params.size * 4)

    # VMEM budget (v7x-safe): 2x input image block + 2x output tile + scratch
    # is a few hundred KiB at these shapes, far below the 32 MiB scoped default.
    out = pl.pallas_call(
        kernel,
        out_shape=jax.ShapeDtypeStruct((N, H, wc), x_nhwc.dtype),
        grid_spec=pltpu.PrefetchScalarGridSpec(
            num_scalar_prefetch=0,
            grid=(N, H // th),
            in_specs=[
                # full image, resident across the H-tile axis (loaded once per n)
                pl.BlockSpec((1, H, wc), lambda n, i: (n, 0, 0)),
                # packed taps + bias, resident for the whole grid
                pl.BlockSpec((10, wc), lambda n, i: (0, 0)),
            ],
            out_specs=pl.BlockSpec((1, th, wc), lambda n, i: (n, i, 0)),
            scratch_shapes=[pltpu.VMEM((th + 2, 2 * pad + wc), jnp.float32)],
        ),
        compiler_params=pltpu.CompilerParams(
            dimension_semantics=("parallel", "parallel")),
        cost_estimate=pl.CostEstimate(
            flops=flops, transcendentals=0, bytes_accessed=bytes_accessed),
    )(x2, params)

    return out.reshape(N, H, W, C)


def reference(x_nhwc, w_dw, bn_gamma, bn_beta, bn_mean, bn_var, eps=1e-5):
    """Pure-JAX reference: x + BN(depthwise_conv3x3(x))."""
    C = x_nhwc.shape[-1]
    filt = w_dw.reshape(3, 3, 1, C)                         # HWIO, groups=C
    conv = lax.conv_general_dilated(
        x_nhwc, filt, window_strides=(1, 1), padding=((1, 1), (1, 1)),
        dimension_numbers=("NHWC", "HWIO", "NHWC"), feature_group_count=C)
    scale = bn_gamma / jnp.sqrt(bn_var + eps)
    bias = bn_beta - bn_mean * scale
    return x_nhwc + conv * scale[None, None, None, :] + bias[None, None, None, :]


if __name__ == "__main__":
    key = jax.random.PRNGKey(0)
    k_x, k_w, k_g, k_b, k_m, k_v = jax.random.split(key, 6)

    # Small RepViT-like shape; W*C = 512 keeps the lane dimension dense.
    N, C, H, W = 2, 32, 16, 16

    # PyTorch-convention NCHW input -> NHWC (the kernel's channels-last layout).
    x_nchw = jax.random.normal(k_x, (N, C, H, W), dtype=jnp.float32)
    x_nhwc = jnp.transpose(x_nchw, (0, 2, 3, 1))

    # Depthwise conv weight: torch shape (C, 1, 3, 3) -> (3, 3, C).
    w_torch = jax.random.normal(k_w, (C, 1, 3, 3), dtype=jnp.float32) * 0.1
    w_dw = jnp.transpose(w_torch[:, 0, :, :], (1, 2, 0))

    # Non-trivial eval-mode BatchNorm statistics to exercise the folding.
    gamma = 1.0 + 0.2 * jax.random.normal(k_g, (C,), dtype=jnp.float32)
    beta = 0.1 * jax.random.normal(k_b, (C,), dtype=jnp.float32)
    r_mean = 0.1 * jax.random.normal(k_m, (C,), dtype=jnp.float32)
    r_var = jax.random.uniform(k_v, (C,), jnp.float32, minval=0.5, maxval=1.5)

    out = residual_dwconv_bn(x_nhwc, w_dw, gamma, beta, r_mean, r_var)
    out = jax.block_until_ready(out)

    ref = reference(x_nhwc, w_dw, gamma, beta, r_mean, r_var)
    assert out.shape == ref.shape
    assert jnp.allclose(out, ref, atol=1e-4, rtol=1e-4), "mismatch vs reference"

    print("KERNEL_OK")
</pallas_src>

<mosaic_0001>
module attributes {stable_mosaic.version = 11 : i64} {
  func.func @_residual_dw3x3_kernel(%arg0: i32, %arg1: i32, %arg2: memref<1x16x512xf32, #tpu.memory_space<vmem>>, %arg3: memref<10x512xf32, #tpu.memory_space<vmem>>, %arg4: memref<1x8x512xf32, #tpu.memory_space<vmem>>, %arg5: memref<10x768xf32, #tpu.memory_space<vmem>>) attributes {dimension_semantics = [#tpu.dimension_semantics<parallel>, #tpu.dimension_semantics<parallel>], iteration_bounds = array<i64: 2, 2>, scalar_prefetch = 0 : i64, scratch_operands = 1 : i64, tpu.core_type = #tpu.core_type<tc>, window_params = [{transform_indices = @transform_0, window_bounds = array<i64: 1, 16, 512>}, {pipeline_mode = #tpu.pipeline_mode<synchronous>, transform_indices = @transform_1, window_bounds = array<i64: 10, 512>}, {transform_indices = @transform_2, window_bounds = array<i64: 1, 8, 512>}]} {
    %c8_i32 = arith.constant 8 : i32
    %0 = arith.muli %arg1, %c8_i32 : i32
    %1 = tpu.assume_multiple %0, 8 : i32
    %cst = arith.constant 0.000000e+00 : f32
    %2 = vector.broadcast %cst : f32 to vector<10x768xf32>
    %c0 = arith.constant 0 : index
    %c0_0 = arith.constant 0 : index
    %3 = vector.load %arg5[%c0, %c0_0] : memref<10x768xf32, #tpu.memory_space<vmem>>, vector<10x768xf32>
    tpu.vector_store %arg5[%c0, %c0_0], %2 {strides = array<i32>} : memref<10x768xf32, #tpu.memory_space<vmem>>, vector<10x768xf32>,
    %c0_1 = arith.constant 0 : index
    %4 = arith.index_cast %1 : i32 to index
    %c0_2 = arith.constant 0 : index
    %5 = vector.load %arg2[%c0_1, %4, %c0_2] : memref<1x16x512xf32, #tpu.memory_space<vmem>>, vector<1x8x512xf32>
    %6 = vector.shape_cast %5 : vector<1x8x512xf32> to vector<8x512xf32>
    %c1 = arith.constant 1 : index
    %c128 = arith.constant 128 : index
    %7 = vector.load %arg5[%c1, %c128] : memref<10x768xf32, #tpu.memory_space<vmem>>, vector<8x512xf32>
    tpu.vector_store %arg5[%c1, %c128], %6 {strides = array<i32>} : memref<10x768xf32, #tpu.memory_space<vmem>>, vector<8x512xf32>,
    %c0_i32 = arith.constant 0 : i32
    %8 = arith.cmpi sgt, %arg1, %c0_i32 : i32
    %9 = arith.extui %8 : i1 to i32
    %c0_i32_3 = arith.constant 0 : i32
    %10 = arith.cmpi ne, %9, %c0_i32_3 : i32
    scf.if %10 {
      %c1_i32_27 = arith.constant 1 : i32
      %69 = arith.subi %1, %c1_i32_27 : i32
      %c0_28 = arith.constant 0 : index
      %70 = arith.index_cast %69 : i32 to index
      %c0_29 = arith.constant 0 : index
      %71 = vector.load %arg2[%c0_28, %70, %c0_29] : memref<1x16x512xf32, #tpu.memory_space<vmem>>, vector<1x1x512xf32>
      %72 = vector.shape_cast %71 : vector<1x1x512xf32> to vector<1x512xf32>
      %c0_30 = arith.constant 0 : index
      %c128_31 = arith.constant 128 : index
      %73 = vector.load %arg5[%c0_30, %c128_31] : memref<10x768xf32, #tpu.memory_space<vmem>>, vector<1x512xf32>
      tpu.vector_store %arg5[%c0_30, %c128_31], %72 {strides = array<i32>} : memref<10x768xf32, #tpu.memory_space<vmem>>, vector<1x512xf32>,
    } else {
    }
    %c1_i32 = arith.constant 1 : i32
    %11 = arith.cmpi slt, %arg1, %c1_i32 : i32
    %12 = arith.extui %11 : i1 to i32
    %c0_i32_4 = arith.constant 0 : i32
    %13 = arith.cmpi ne, %12, %c0_i32_4 : i32
    scf.if %13 {
      %c8_i32_27 = arith.constant 8 : i32
      %69 = arith.addi %1, %c8_i32_27 : i32
      %c0_28 = arith.constant 0 : index
      %70 = arith.index_cast %69 : i32 to index
      %c0_29 = arith.constant 0 : index
      %71 = vector.load %arg2[%c0_28, %70, %c0_29] : memref<1x16x512xf32, #tpu.memory_space<vmem>>, vector<1x1x512xf32>
      %72 = vector.shape_cast %71 : vector<1x1x512xf32> to vector<1x512xf32>
      %c9_30 = arith.constant 9 : index
      %c128_31 = arith.constant 128 : index
      %73 = vector.load %arg5[%c9_30, %c128_31] : memref<10x768xf32, #tpu.memory_space<vmem>>, vector<1x512xf32>
      tpu.vector_store %arg5[%c9_30, %c128_31], %72 {strides = array<i32>} : memref<10x768xf32, #tpu.memory_space<vmem>>, vector<1x512xf32>,
    } else {
    }
    %cst_5 = arith.constant 0.000000e+00 : f32
    %14 = vector.broadcast %cst_5 : f32 to vector<8x512xf32>
    %c0_6 = arith.constant 0 : index
    %c0_7 = arith.constant 0 : index
    %15 = vector.load %arg5[%c0_6, %c0_7] : memref<10x768xf32, #tpu.memory_space<vmem>>, vector<8x768xf32>
    %c0_8 = arith.constant 0 : index
    %c0_9 = arith.constant 0 : index
    %16 = vector.load %arg3[%c0_8, %c0_9] : memref<10x512xf32, #tpu.memory_space<vmem>>, vector<1x512xf32>
    %17 = vector.extract_strided_slice %15 {offsets = [0, 96], sizes = [8, 512], strides = [1, 1]} : vector<8x768xf32> to vector<8x512xf32>
    %18 = vector.broadcast %16 : vector<1x512xf32> to vector<8x512xf32>
    %19 = arith.mulf %17, %18 : vector<8x512xf32>
    %20 = arith.addf %14, %19 : vector<8x512xf32>
    %c1_10 = arith.constant 1 : index
    %c0_11 = arith.constant 0 : index
    %21 = vector.load %arg3[%c1_10, %c0_11] : memref<10x512xf32, #tpu.memory_space<vmem>>, vector<1x512xf32>
    %22 = vector.extract_strided_slice %15 {offsets = [0, 128], sizes = [8, 512], strides = [1, 1]} : vector<8x768xf32> to vector<8x512xf32>
    %23 = vector.broadcast %21 : vector<1x512xf32> to vector<8x512xf32>
    %24 = arith.mulf %22, %23 : vector<8x512xf32>
    %25 = arith.addf %20, %24 : vector<8x512xf32>
    %c2 = arith.constant 2 : index
    %c0_12 = arith.constant 0 : index
    %26 = vector.load %arg3[%c2, %c0_12] : memref<10x512xf32, #tpu.memory_space<vmem>>, vector<1x512xf32>
    %27 = vector.extract_strided_slice %15 {offsets = [0, 160], sizes = [8, 512], strides = [1, 1]} : vector<8x768xf32> to vector<8x512xf32>
    %28 = vector.broadcast %26 : vector<1x512xf32> to vector<8x512xf32>
    %29 = arith.mulf %27, %28 : vector<8x512xf32>
    %30 = arith.addf %25, %29 : vector<8x512xf32>
    %c1_13 = arith.constant 1 : index
    %c0_14 = arith.constant 0 : index
    %31 = vector.load %arg5[%c1_13, %c0_14] : memref<10x768xf32, #tpu.memory_space<vmem>>, vector<8x768xf32>
    %c3 = arith.constant 3 : index
    %c0_15 = arith.constant 0 : index
    %32 = vector.load %arg3[%c3, %c0_15] : memref<10x512xf32, #tpu.memory_space<vmem>>, vector<1x512xf32>
    %33 = vector.extract_strided_slice %31 {offsets = [0, 96], sizes = [8, 512], strides = [1, 1]} : vector<8x768xf32> to vector<8x512xf32>
    %34 = vector.broadcast %32 : vector<1x512xf32> to vector<8x512xf32>
    %35 = arith.mulf %33, %34 : vector<8x512xf32>
    %36 = arith.addf %30, %35 : vector<8x512xf32>
    %c4 = arith.constant 4 : index
    %c0_16 = arith.constant 0 : index
    %37 = vector.load %arg3[%c4, %c0_16] : memref<10x512xf32, #tpu.memory_space<vmem>>, vector<1x512xf32>
    %38 = vector.extract_strided_slice %31 {offsets = [0, 128], sizes = [8, 512], strides = [1, 1]} : vector<8x768xf32> to vector<8x512xf32>
    %39 = vector.broadcast %37 : vector<1x512xf32> to vector<8x512xf32>
    %40 = arith.mulf %38, %39 : vector<8x512xf32>
    %41 = arith.addf %36, %40 : vector<8x512xf32>
    %c5 = arith.constant 5 : index
    %c0_17 = arith.constant 0 : index
    %42 = vector.load %arg3[%c5, %c0_17] : memref<10x512xf32, #tpu.memory_space<vmem>>, vector<1x512xf32>
    %43 = vector.extract_strided_slice %31 {offsets = [0, 160], sizes = [8, 512], strides = [1, 1]} : vector<8x768xf32> to vector<8x512xf32>
    %44 = vector.broadcast %42 : vector<1x512xf32> to vector<8x512xf32>
    %45 = arith.mulf %43, %44 : vector<8x512xf32>
    %46 = arith.addf %41, %45 : vector<8x512xf32>
    %c2_18 = arith.constant 2 : index
    %c0_19 = arith.constant 0 : index
    %47 = vector.load %arg5[%c2_18, %c0_19] : memref<10x768xf32, #tpu.memory_space<vmem>>, vector<8x768xf32>
    %c6 = arith.constant 6 : index
    %c0_20 = arith.constant 0 : index
    %48 = vector.load %arg3[%c6, %c0_20] : memref<10x512xf32, #tpu.memory_space<vmem>>, vector<1x512xf32>
    %49 = vector.extract_strided_slice %47 {offsets = [0, 96], sizes = [8, 512], strides = [1, 1]} : vector<8x768xf32> to vector<8x512xf32>
    %50 = vector.broadcast %48 : vector<1x512xf32> to vector<8x512xf32>
    %51 = arith.mulf %49, %50 : vector<8x512xf32>
    %52 = arith.addf %46, %51 : vector<8x512xf32>
    %c7 = arith.constant 7 : index
    %c0_21 = arith.constant 0 : index
    %53 = vector.load %arg3[%c7, %c0_21] : memref<10x512xf32, #tpu.memory_space<vmem>>, vector<1x512xf32>
    %54 = vector.extract_strided_slice %47 {offsets = [0, 128], sizes = [8, 512], strides = [1, 1]} : vector<8x768xf32> to vector<8x512xf32>
    %55 = vector.broadcast %53 : vector<1x512xf32> to vector<8x512xf32>
    %56 = arith.mulf %54, %55 : vector<8x512xf32>
    %57 = arith.addf %52, %56 : vector<8x512xf32>
    %c8 = arith.constant 8 : index
    %c0_22 = arith.constant 0 : index
    %58 = vector.load %arg3[%c8, %c0_22] : memref<10x512xf32, #tpu.memory_space<vmem>>, vector<1x512xf32>
    %59 = vector.extract_strided_slice %47 {offsets = [0, 160], sizes = [8, 512], strides = [1, 1]} : vector<8x768xf32> to vector<8x512xf32>
    %60 = vector.broadcast %58 : vector<1x512xf32> to vector<8x512xf32>
    %61 = arith.mulf %59, %60 : vector<8x512xf32>
    %62 = arith.addf %57, %61 : vector<8x512xf32>
    %c9 = arith.constant 9 : index
    %c0_23 = arith.constant 0 : index
    %63 = vector.load %arg3[%c9, %c0_23] : memref<10x512xf32, #tpu.memory_space<vmem>>, vector<1x512xf32>
    %64 = vector.broadcast %63 : vector<1x512xf32> to vector<8x512xf32>
    %65 = arith.addf %62, %64 : vector<8x512xf32>
    %c0_24 = arith.constant 0 : index
    %c0_25 = arith.constant 0 : index
    %c0_26 = arith.constant 0 : index
    %66 = vector.load %arg4[%c0_24, %c0_25, %c0_26] : memref<1x8x512xf32, #tpu.memory_space<vmem>>, vector<1x8x512xf32>
    %67 = vector.shape_cast %66 : vector<1x8x512xf32> to vector<8x512xf32>
    %68 = vector.shape_cast %65 : vector<8x512xf32> to vector<1x8x512xf32>
    tpu.vector_store %arg4[%c0_24, %c0_25, %c0_26], %68 {strides = array<i32>} : memref<1x8x512xf32, #tpu.memory_space<vmem>>, vector<1x8x512xf32>,
    return
  }
  func.func @transform_0(%arg0: i32, %arg1: i32) -> (i32, i32, i32) {
    %c0_i32 = arith.constant 0 : i32
    %c0_i32_0 = arith.constant 0 : i32
    %c0_i32_1 = arith.constant 0 : i32
    return %arg0, %c0_i32, %c0_i32_0 : i32, i32, i32
  }
  func.func @transform_1(%arg0: i32, %arg1: i32) -> (i32, i32) {
    %c0_i32 = arith.constant 0 : i32
    %c0_i32_0 = arith.constant 0 : i32
    %c0_i32_1 = arith.constant 0 : i32
    return %c0_i32, %c0_i32_0 : i32, i32
  }
  func.func @transform_2(%arg0: i32, %arg1: i32) -> (i32, i32, i32) {
    %c0_i32 = arith.constant 0 : i32
    %c0_i32_0 = arith.constant 0 : i32
    return %arg0, %arg1, %c0_i32 : i32, i32, i32
  }
}

</mosaic_0001>

<bundles_post_ra>
// kernel: tpu_custom_call.1
= control target key start
LH: loop header
LB: loop body
LE: loop exit
PB: predicated region body
PF: predicated region fallthrough
CT: control target
= control target key end

     0   :  { %s1945_s0 = inlined_call_operand.hbm [shape: f32[2,16,512], index: 0, kind: input, shape index: {}]   ;;  %s1946_s1 = inlined_call_operand.hbm [shape: f32[10,512], index: 1, kind: input, shape index: {}]   ;;  %s1947_s2 = inlined_call_operand.hbm [shape: f32[2,16,512], index: 2, kind: output, shape index: {}]  }
   0x1   :  { %1957 = sst [smem:[#allocation18_spill]] %s1946_s1 }
   0x2   :  { %7 = vsyncpa [#allocation4], 0 }
   0x3   :  { %9 = vsyncpa [#allocation4 + $0x1], 0 }
   0x4   :  { %10 = vsyncpa [#allocation7], 0 }
   0x5   :  { %11 = vsyncpa [#allocation5], 0 }
   0x6   :  { %13 = vsyncpa [#allocation5 + $0x1], 0  ;;  %s1396_s9 = smov 0   ;;  %s1398_s10 = smov 0  }
   0x7   :  { %s1400_s11 = smov 0   ;;  %s1402_s12 = smov 0  }
   0x8   :  { %s1404_s13 = smov 0   ;;  %s1406_s14 = smov 0  }
   0x9   :  { %s1408_s15 = smov 0   ;;  %s1410_s16 = smov 0  }
   0xa   :  { %s1412_s17 = smov 0   ;;  %s1414_s18 = smov 0  }
   0xb   :  { %s1416_s19 = smov 0  }
   0xc LB: > { %1958 = sst [smem:[#allocation12_spill]] %s1332_s9  ;;  %s1035_s20 = sadd.s32 4294967295, %s1372_s19   ;;  %s1372_s19 = sphi %s1416_s19, %s19_s19   ;;  %s1368_s18 = sphi %s1414_s18, %s1986_s18   ;;  %s1364_s17 = sphi %s1412_s17, %s1977_s17   ;;  %s1360_s16 = sphi %s1410_s16, %s1985_s16   ;;  %s1356_s15 = sphi %s1408_s15, %s1976_s15   ;;  %s1352_s14 = sphi %s1406_s14, %s1984_s14   ;;  %s1348_s13 = sphi %s1404_s13, %s1983_s13   ;;  %s1344_s12 = sphi %s1402_s12, %s1982_s12   ;;  %s1340_s11 = sphi %s1400_s11, %s1981_s11   ;;  %s1336_s10 = sphi %s1398_s10, %s1980_s10   ;;  %s1332_s9 = sphi %s1396_s9, %s1979_s9  }
   0xd   : > { %1959 = sst [smem:[#allocation13_spill]] %s1364_s17  ;;  %s1036_s21 = sadd.s32 4294967294, %s1372_s19  }
   0xe   : > { %p51_p0 = scmp.ne.s32.totalorder %s1348_s13, %s1344_s12  ;;  %p1452_p1 = scmp.eq.s32.totalorder %s1035_s20, 0 }
   0xf   : > { %p97_p2 = scmp.ne.s32.totalorder %s1340_s11, %s1336_s10  ;;  %p98_p3 = scmp.eq.s32.totalorder %s1035_s20, 3 }
  0x10   : > { %p1460_p4 = por %p1452_p1, %p51_p0  ;;  %p103_p5 = scmp.ne.s32.totalorder %s1336_s10, %s1332_s9 }
  0x11   : > { %p1466_p6 = por %p98_p3, %p97_p2  ;;  %p104_p7 = scmp.eq.s32.totalorder %s1036_s21, 3 }
  0x12   : > { %p1037_p8 = scmp.ge.s32.totalorder %s1372_s19, 1  ;;  %p111_p9 = scmp.lt.s32.totalorder %s1372_s19, 5 }
  0x13   : > { %s1962_s24 = scalar_select %p1466_p6, 1, 0 }
  0x14   : > { %p1472_p10 = por %p104_p7, %p103_p5  ;;  %p1476_p11 = pnand %p1037_p8, %p111_p9 }
  0x15   : > { %1963 = sst [smem:[#allocation14_spill]] %s1962_s24  ;;  %s1374_s30 = smov [#allocation6]  }
  0x16   : > { %s1964_s25 = scalar_select %p1472_p10, 1, 0 }
  0x17   : > { %s1967_s1 = sld [smem:[#allocation18_spill]]  ;;  %p1075_p12 = pneg %p1476_p11 }
  0x18   : > { %1965 = sst [smem:[#allocation15_spill]] %s1964_s25  ;;  %s124_s3 = sshll.u32 %s1374_s30, 4  ;;  %s125_s3 = int_to_ptr.vmem [resolvable:$true] %s124_s3 }
  0x19   : > { %p1076_p13 = pnand %p1075_p12, %p1452_p1  ;;  %s1948_s4 = smov 512  }
  0x1a   : > { %s1949_s5 = smov 32   ;;  %s28_s6 = sadd.s32 1, %s1364_s17 }
  0x1b   : > { %s31_s7 = sadd.s32 1, %s1368_s18  ;;  %p29_p0 = scmp.ge.s32.totalorder %s28_s6, 2 }
  0x1c   : > { %s38_s8 = sadd.s32 1, %s1352_s14  ;;  %p45_p2 = scmp.ne.s32.totalorder %s1352_s14, %s1348_s13 }
  0x1d   : > { %s122_s29 = sshll.u32 %s1967_s1, 4  ;;  %p46_p3 = scmp.eq.s32.totalorder %s1372_s19, 0  ;;  %s123_s29 = int_to_ptr.hbm [resolvable:$true] %s122_s29 }
  0x1e   : > { %1078 = dma.hbm_to_vmem [thread:$0]  (!%p1076_p13), %s123_s29, 1024, %s125_s3, [#allocation7], %s1948_s4, %s1948_s4, %s1949_s5  }
  0x1f   : > { %s1988_s6 = smov (%p29_p0, %s28_s6), 0  ;;  %s1990_s7 = smov (!%p29_p0, %s31_s7), %s1368_s18 }
  0x20   : > { %1968 = sst [smem:[#allocation16_spill]] %s1988_s6  ;;  %p1499_p5 = por %p46_p3, %p45_p2 }
  0x21   : > { %s83_s20 = ssub.s32 %s1364_s17, %s1988_s6  ;;  %p33_p7 = scmp.ge.s32.totalorder %s1990_s7, 2 }
  0x22   : > { %s87_s21 = sadd.s32 1, %s1340_s11  ;;  %p1088_p8 = scmp.lt.s32.totalorder %s1372_s19, 4 }
  0x23   : > { %s138_s27 = sand.u32 1, %s1352_s14   ;;  %s1992_s7 = smov (%p33_p7, %s1990_s7), 0 }
  0x24   : > { %1970 = sst [smem:[#allocation17_spill]] %s1992_s7  ;;  %s1040_s28 = sshll.u32 %s138_s27, 6 }
  0x25   : > { %s35_s29 = ssub.s32 %s1368_s18, %s1992_s7  ;;  %s1063_s3 = sshll.u32 %s1368_s18, 6 }
  0x26   : > { %p36_p9 = scmp.eq.s32.totalorder %s35_s29, 0  ;;  %s84_s30 = sor.u32 %s83_s20, %s35_s29 }
  0x27   : > { %p85_p12 = scmp.eq.s32.totalorder %s84_s30, 0  ;;  %s147_s17 = scalar_lea.hbm %s1945_s0, %s1063_s3 }
  0x28   : > { %s1514_s4 = scalar_select %p36_p9, %s1352_s14, %s38_s8  }
  0x29   : > { %s1517_s5 = scalar_select %p85_p12, %s1340_s11, %s87_s21  }
  0x2a   : > { %s142_s25 = scalar_lea.vmem [#allocation3], %s1040_s28  ;;  %s148_s24 = sshll.u32 %s147_s17, 4  ;;  %s149_s24 = int_to_ptr.hbm [resolvable:$true] %s148_s24 }
  0x2b   : > { %s150_s9 = sshll.u32 %s142_s25, 4  ;;  %p1080_p13 = pnand %p1088_p8, %p1499_p5  ;;  %s151_s9 = int_to_ptr.vmem [resolvable:$true] %s150_s9 }
  0x2c   : > { %s139_s7 = scalar_lea.sflag [#allocation4], %s138_s27  ;;  %s1971_s20 = smov 32  }
  0x2d   : > { %s1972_s29 = smov 512   ;;  %162 = sbr.rel (%p1476_p11) target bundleno = 515 (0x203), region = 28 }
  0x2e   : > { %1082 = dma.hbm_to_vmem [thread:$0]  (!%p1080_p13), %s149_s24, 1024, %s151_s9, %s139_s7, %s1972_s29, %s1972_s29, %s1971_s20  }
  0x2f   : > { %s164_s1 = sand.u32 (!%p1476_p11), 1, %s1348_s13  }
  0x30   : > { %s1044_s6 = sshll.u32 (!%p1476_p11), %s164_s1, 6  ;;  %s165_s8 = scalar_lea.sflag (!%p1476_p11), [#allocation4], %s164_s1 }
  0x31   : > { %s1532_s25 = scalar_lea.vmem (!%p1476_p11), [#allocation3], %s1044_s6 }
  0x32   : > { %1319 = dma.done.wait (%p1460_p4), %s165_s8, 1024  }
  0x33   : > { %1321 = vsyncadd (%p1460_p4), %s165_s8, 4294966272 }
  0x34   : > { %1323 = dma.done.wait (%p1452_p1), [#allocation7], 1024  }
  0x35   : > { %1325 = vsyncadd (%p1452_p1), [#allocation7], 4294966272  ;;  %s192_s9 = sand.u32 1, %s1336_s10   ;;  %s1544_s17 = sshll.u32 %s1356_s15, 3  ;;  %v1377_v0 = vmov 0.0  }
  0x36   : > { %197 = vst [vmem:[#allocation2 + $0x8] sm:$0xff] %v1377_v0  ;;  %s1548_s24 = sshll.u32 %s192_s9, 5  ;;  %s208_s23 = sshra.s32 %s1544_s17, 3 }
  0x37   : > { %196 = vst [vmem:[#allocation2] sm:$0xff] %v1377_v0  ;;  %s1064_s26 = sshll.u32 %s208_s23, 5  ;;  %s1553_s7 = scalar_lea.vmem [#allocation8], %s1548_s24 }
  0x38   : > { %198 = vst [vmem:[#allocation2 + $0x10] sm:$0xff] %v1377_v0  ;;  %s212_s22 = scalar_lea.vmem %s1532_s25, %s1064_s26 [#allocation3]  ;;  %p1050_p1 = scmp.le.s32.totalorder %s1356_s15, 0 }
  0x39   : > { %199 = vst [vmem:[#allocation2 + $0x18] sm:$0xff] %v1377_v0  ;;  %v213_v1 = vld [vmem:[%s212_s22] sm:$0xff]  ;;  %v214_v2 = vld [vmem:[%s212_s22 + $0x8] sm:$0xff]  ;;  %v215_v4 = vld [vmem:[%s212_s22 + $0x10] sm:$0xff]  ;;  %s1051_s12 = sadd.s32 (!%p1050_p1), 4294967295, %s1544_s17 }
  0x3a   : > { %200 = vst [vmem:[#allocation2 + $0x20] sm:$0xff] %v1377_v0  ;;  %v221_v3 = vrot.slane %v213_v1, 7  ;;  %v222_v5 = vrot.slane %v214_v2, 7  ;;  %v216_v6 = vld [vmem:[%s212_s22 + $0x18] sm:$0xff]  ;;  %v223_v7 = vrot.slane %v215_v4, 7  ;;  %s242_s21 = sshra.s32 (!%p1050_p1), %s1051_s12, 3 }
  0x3b   : > { %201 = vst [vmem:[#allocation2 + $0x28] sm:$0xff] %v1377_v0  ;;  %v224_v8 = vrot.slane %v216_v6, 7  ;;  %s245_s27 = sand.u32 (!%p1050_p1), 7, %s1051_s12  ;;  %s1065_s28 = sshll.u32 (!%p1050_p1), %s242_s21, 5 }
  0x3c   : > { %202 = vst [vmem:[#allocation2 + $0x30] sm:$0x3] %v1377_v0  ;;  %s248_s30 = sadd.s32 (!%p1050_p1), %s1065_s28, %s245_s27 }
  0x3d   : > { %203 = vst [vmem:[#allocation2 + $0x38] sm:$0x3] %v1377_v0  ;;  %s249_s3 = scalar_lea.vmem (!%p1050_p1), %s1532_s25, %s248_s30 [#allocation3] }
  0x3e   : > { %204 = vst [vmem:[#allocation2 + $0x40] sm:$0x3] %v1377_v0 }
  0x3f   : > { %205 = vst [vmem:[#allocation2 + $0x48] sm:$0x3] %v1377_v0 }
  0x40   : > { %206 = vst [vmem:[#allocation2 + $0x50] sm:$0x3] %v1377_v0 }
  0x41   : > { %207 = vst [vmem:[#allocation2 + $0x58] sm:$0x3] %v1377_v0 }
  0x42   : > { %229 = vst [vmem:[#allocation2 + $0x8] sm:$0xfe] %v221_v3 }
  0x43   : > { %233 = vst [vmem:[#allocation2 + $0x38] sm:$0x1] %v221_v3 }
  0x44   : > { %230 = vst [vmem:[#allocation2 + $0x10] sm:$0xfe] %v222_v5 }
  0x45   : > { %234 = vst [vmem:[#allocation2 + $0x40] sm:$0x1] %v222_v5  ;;  %240 = sbr.rel (%p1050_p1) target bundleno = 78 (0x4e), region = 40 }
  0x46   : > { %231 = vst [vmem:[#allocation2 + $0x18] sm:$0xfe] %v223_v7 }
  0x47   : > { %235 = vst [vmem:[#allocation2 + $0x48] sm:$0x1] %v223_v7 }
  0x48   : > { %232 = vst [vmem:[#allocation2 + $0x20] sm:$0xfe] %v224_v8 }
  0x49   : > { %236 = vst [vmem:[#allocation2 + $0x50] sm:$0x1] %v224_v8 }
  0x4a   : > { %v251_v9 = vlaneseq  ;;  %v250_v10 = vld [vmem:[%s249_s3] ss:$8 sm:$0xf] }
  0x4c   : > { %vm253_vm0 = vcmp.lt.s32.totalorder %v251_v9, 512 }
  0x4d   : > { %256 = vst.msk [vmem:[#allocation2 + $0x8] ss:$8 sm:$0xf] %vm253_vm0, %v250_v10 }
  0x4e PF: > { %p1054_p4 = scmp.ge.s32.totalorder %s1356_s15, 1 }
  0x4f   : > { %s262_s20 = sadd.s32 (!%p1054_p4), 8, %s1544_s17 }
  0x50   : > { %261 = sbr.rel (%p1054_p4) target bundleno = 89 (0x59), region = 44  ;;  %s263_s29 = sshra.s32 (!%p1054_p4), %s262_s20, 3 }
  0x51   : > { %s1066_s1 = sshll.u32 (!%p1054_p4), %s263_s29, 5 }
  0x52   : > { %s267_s6 = scalar_lea.vmem (!%p1054_p4), %s1532_s25, %s1066_s1 [#allocation3] }
  0x55   : > { %v269_v11 = vlaneseq  ;;  %v268_v12 = vld [vmem:[%s267_s6] ss:$8 sm:$0xf] }
  0x57   : > { %vm271_vm1 = vcmp.lt.s32.totalorder %v269_v11, 512 }
  0x58   : > { %274 = vst.msk [vmem:[#allocation2 + $0x39] ss:$8 sm:$0xf] %vm271_vm1, %v268_v12 }
  0x59 PF: > { %v282_v13 = vld [vmem:[#allocation6] ss:$8 sm:$0xf]  ;;  %v316_v17 = vld [vmem:[#allocation6 + $0x1] ss:$8 sm:$0xf] }
  0x5a   : > { %v286_v14 = vperm.slane %v282_v13, 2  ;;  %v284_v15 = vperm.slane %v282_v13, 0  ;;  %v1561_v16 = vld [vmem:[#allocation2 + $0x8] sm:$0xff]  ;;  %v318_v18 = vperm.slane %v316_v17, 0  ;;  %s1378_s8 = smov 96   ;;  %v319_v20 = vperm.slane %v316_v17, 1 }
  0x5b   : > { %v287_v21 = vperm.slane %v282_v13, 3  ;;  %v285_v22 = vperm.slane %v282_v13, 1  ;;  %v1567_v23 = vld [vmem:[#allocation2 + $0x10] sm:$0xff]  ;;  %v321_v25 = vperm.slane %v316_v17, 3  ;;  %v320_v26 = vperm.slane %v316_v17, 2  ;;  %v1572_v27 = vld [vmem:[#allocation2 + $0x20] sm:$0xff] }
  0x5c   : > { %292 = vrot.lane.b32.xlu1 %v286_v14, %s1378_s8  ;;  %288 = vrot.lane.b32.xlu0 %v284_v15, %s1378_s8  ;;  %v326_v19 = vmul.f32 %v318_v18, %v1561_v16  ;;  %v327_v24 = vmul.f32 %v319_v20, %v1567_v23  ;;  %v1574_v28 = vld [vmem:[#allocation2 + $0x18] sm:$0xff]  ;;  %s1379_s25 = smov 32   ;;  %v1598_v52 = vld [vmem:[#allocation2 + $0x8] sm:$0xfe]  ;;  %v1607_v61 = vld [vmem:[#allocation2 + $0x20] sm:$0xfe] }
  0x5d   : > { %v329_v29 = vmul.f32 %v321_v25, %v1572_v27  ;;  %v328_v30 = vmul.f32 %v320_v26, %v1574_v28  ;;  %v356_v31 = vld [vmem:[#allocation6 + $0x2] ss:$8 sm:$0xf]  ;;  %v556_v36 = vld [vmem:[#allocation6 + $0x5] ss:$8 sm:$0xf] }
  0x5e   : > { %334 = vrot.lane.b32.xlu2 %v326_v19, %s1378_s8  ;;  %v358_v32 = vperm.slane %v356_v31, 0  ;;  %v360_v33 = vperm.slane %v356_v31, 2  ;;  %v359_v34 = vperm.slane %v356_v31, 1  ;;  %v361_v35 = vperm.slane %v356_v31, 3  ;;  %v1600_v53 = vld [vmem:[#allocation2 + $0x38] sm:$0x1] }
  0x5f   : > { %v559_v37 = vperm.slane %v556_v36, 1  ;;  %v558_v38 = vperm.slane %v556_v36, 0  ;;  %v560_v39 = vperm.slane %v556_v36, 2  ;;  %v779_v40 = vld [vmem:[#allocation6 + $0x20] ss:$8 sm:$0xf] }
  0x60   : > { %v781_v41 = vperm.slane %v779_v40, 0  ;;  %v561_v42 = vperm.slane %v556_v36, 3  ;;  %v782_v43 = vperm.slane %v779_v40, 1  ;;  %v784_v44 = vperm.slane %v779_v40, 3  ;;  %v1609_v62 = vld [vmem:[#allocation2 + $0x50] sm:$0x1] }
  0x61   : > { %v783_v45 = vperm.slane %v779_v40, 2  ;;  %v427_v46 = vld [vmem:[#allocation6 + $0x3] ss:$8 sm:$0xf]  ;;  %vm469_vm2 = vcmask 1046528   ;;  %vm692_vm3 = vcmask 1045504  }
  0x62   : > { %v431_v47 = vperm.slane %v427_v46, 2  ;;  %v429_v48 = vperm.slane %v427_v46, 0  ;;  %v1593_v49 = vld [vmem:[#allocation6 + $0x4] ss:$8 sm:$0xf]  ;;  %v432_v57 = vperm.slane %v427_v46, 3 }
  0x63   : > { %v650_v50 = vld [vmem:[#allocation6 + $0x6] ss:$8 sm:$0xf]  ;;  %v498_v51 = vperm.slane %v1593_v49, 0  ;;  %v501_v58 = vperm.slane %v1593_v49, 3  ;;  %v430_v3 = vperm.slane %v427_v46, 1 }
  0x64   : > { %294 = vrot.lane.b32.xlu1 %v287_v21, %s1378_s8  ;;  %290 = vrot.lane.b32.xlu0 %v285_v22, %s1378_s8  ;;  %v653_v54 = vperm.slane %v650_v50, 1  ;;  %v1614_v2 = vld [vmem:[#allocation6 + $0x7] ss:$8 sm:$0xf]  ;;  %v654_v4 = vperm.slane %v650_v50, 2  ;;  %v499_v10 = vperm.slane %v1593_v49, 1 }
  0x65   : > { %v506_v55 = vmul.f32 %v498_v51, %v1598_v52  ;;  %v510_v56 = vmul.f32 %v498_v51, %v1600_v53  ;;  %v509_v63 = vmul.f32 %v501_v58, %v1607_v61  ;;  %v513_v0 = vmul.f32 %v501_v58, %v1609_v62  ;;  %v1620_v8 = vld [vmem:[#allocation2 + $0x8] sm:$0xfc]  ;;  %v1622_v9 = vld [vmem:[#allocation2 + $0x38] sm:$0x3]  ;;  %v1627_v13 = vld [vmem:[#allocation2 + $0x10] sm:$0xfe] }
  0x66   : > { %336 = vrot.lane.b32.xlu2 %v327_v24, %s1378_s8  ;;  %v721_v7 = vperm.slane %v1614_v2, 0  ;;  %v1629_v14 = vld [vmem:[#allocation2 + $0x40] sm:$0x1]  ;;  %v652_v17 = vperm.slane %v650_v50, 0  ;;  %v507_v18 = vmul.f32 %v499_v10, %v1627_v13  ;;  %v724_v25 = vperm.slane %v1614_v2, 3  ;;  %s1380_s17 = smov 64  }
  0x67   : > { %v522_v59 = vrot.slane %v506_v55, 1  ;;  %v523_v60 = vrot.slane %v510_v56, 1  ;;  %v531_v5 = vrot.slane %v509_v63, 1  ;;  %v532_v6 = vrot.slane %v513_v0, 1  ;;  %v1669_v58 = vld [vmem:[#allocation2 + $0x48] sm:$0x3] }
  0x68   : > { %v729_v12 = vmul.f32 %v721_v7, %v1620_v8  ;;  %v733_v15 = vmul.f32 %v721_v7, %v1622_v9  ;;  %v511_v19 = vmul.f32 %v499_v10, %v1629_v14  ;;  %v525_v20 = vrot.slane %v507_v18, 1  ;;  %v276_v7 = vld [vmem:[#allocation2] sm:$0xff]  ;;  %s1058_s24 = sshll.u32 %s1356_s15, 2  ;;  %s1059_s23 = sshll.u32 %s1360_s16, 3 }
  0x69   : > { %v524_v1 = vsel %vm469_vm2, %v522_v59, %v523_v60  ;;  %v533_v11 = vsel %vm469_vm2, %v531_v5, %v532_v6  ;;  %v655_v31 = vperm.slane %v650_v50, 3  ;;  %v723_v56 = vperm.slane %v1614_v2, 2  ;;  %s927_s26 = sadd.s32 %s1059_s23, %s1058_s24  ;;  %s931_s28 = sshll.u32 %s1553_s7, 4  ;;  %s932_s28 = int_to_ptr.vmem [resolvable:$true] %s931_s28 }
  0x6a   : > { %v526_v21 = vrot.slane %v511_v19, 1  ;;  %v745_v22 = vrot.slane %v729_v12, 2  ;;  %v746_v24 = vrot.slane %v733_v15, 2  ;;  %vm296_vm4 = vcmask 785408   ;;  %v281_v15 = vld [vmem:[#allocation2 + $0x28] sm:$0xff]  ;;  %s1060_s22 = sshll.u32 %s927_s26, 3 }
  0x6b   : > { %v735_v63 = vmul.f32 %v723_v56, %v1669_v58  ;;  %vm370_vm5 = vcmask 261120   ;;  %vm399_vm6 = vcmask 523264   ;;  %s929_s27 = scalar_lea.hbm %s1947_s2, %s1060_s22  ;;  %s916_s15 = scalar_lea.sflag [#allocation5], %s192_s9 }
  0x6c   : > { %340 = vrot.lane.b32.xlu1 %v329_v29, %s1378_s8  ;;  %338 = vrot.lane.b32.xlu0 %v328_v30, %s1378_s8  ;;  %v527_v26 = vsel %vm469_vm2, %v525_v20, %v526_v21  ;;  %v1638_v29 = vld [vmem:[#allocation2 + $0x20] sm:$0xfc]  ;;  %v1640_v30 = vld [vmem:[#allocation2 + $0x50] sm:$0x3]  ;;  %s933_s30 = sshll.u32 %s929_s27, 4  ;;  %s1266_s6 = scalar_lea.hbm %s1947_s2, 128  ;;  %s934_s30 = int_to_ptr.hbm [resolvable:$true] %s933_s30 }
  0x6d   : > { %s1260_s16 = sshra.s32 %s934_s30, 4  ;;  %s1261_s16 = int_to_ptr.hbm [resolvable:$true] %s1260_s16 }
  0x6e   : > { %362 = vrot.lane.b32.xlu2 %v358_v32, %s1379_s25  ;;  %v747_v32 = vsel %vm692_vm3, %v745_v22, %v746_v24  ;;  %s1262_s20 = scalar_lea.hbm %s1261_s16, 32  ;;  %p1267_p3 = scmp.lt.s32.totalorder %s1261_s16, %s1947_s2 }
  0x6f   : > { %p1263_p11 = scmp.ne.s32.totalorder %s1261_s16, %s1262_s20  ;;  %p1268_p5 = scmp.lt.s32.totalorder %s1266_s6, %s1262_s20 }
  0x71   : > { %p1264_p0 = pnand %p1263_p11, %p1466_p6  ;;  %p1269_p7 = por %p1268_p5, %p1267_p3 }
  0x73   : > { %p1265_p2 = pneg %p1264_p0 }
  0x74   : > { %366 = vrot.lane.b32.xlu1 %v360_v33, %s1379_s25  ;;  %364 = vrot.lane.b32.xlu0 %v359_v34, %s1379_s25  ;;  %v732_v33 = vmul.f32 %v724_v25, %v1638_v29  ;;  %v736_v34 = vmul.f32 %v724_v25, %v1640_v30 }
  0x75   : > { %p1270_p8 = pnand %p1269_p7, %p1265_p2 }
  0x76   : > { %368 = vrot.lane.b32.xlu2 %v361_v35, %s1379_s25  ;;  %v500_v35 = vperm.slane %v1593_v49, 2  ;;  %v754_v36 = vrot.slane %v732_v33, 2 }
  0x7c   : > { %564 = vrot.lane.b32.xlu1 %v559_v37, %s1379_s25  ;;  %562 = vrot.lane.b32.xlu0 %v558_v38, %s1379_s25  ;;  %v755_v37 = vrot.slane %v736_v34, 2  ;;  %v1649_v38 = vld [vmem:[#allocation2 + $0x18] sm:$0xfe] }
  0x7d   : > { %v508_v40 = vmul.f32 %v500_v35, %v1649_v38 }
  0x7e   : > { %566 = vrot.lane.b32.xlu2 %v560_v39, %s1379_s25  ;;  %v1651_v39 = vld [vmem:[#allocation2 + $0x48] sm:$0x1] }
  0x84   : > { %785 = vrot.lane.b32.xlu1 %v781_v41, %s1379_s25  ;;  %568 = vrot.lane.b32.xlu0 %v561_v42, %s1379_s25  ;;  %v512_v41 = vmul.f32 %v500_v35, %v1651_v39  ;;  %v722_v42 = vperm.slane %v1614_v2, 1 }
  0x86   : > { %787 = vrot.lane.b32.xlu2 %v782_v43, %s1379_s25  ;;  %v528_v43 = vrot.slane %v508_v40, 1 }
  0x8c   : > { %791 = vrot.lane.b32.xlu1 %v784_v44, %s1379_s25  ;;  %789 = vrot.lane.b32.xlu0 %v783_v45, %s1379_s25  ;;  %v529_v44 = vrot.slane %v512_v41, 1  ;;  %v1656_v45 = vld [vmem:[#allocation2 + $0x10] sm:$0xfc] }
  0x8d   : > { %v730_v49 = vmul.f32 %v722_v42, %v1656_v45 }
  0x8e   : > { %435 = vrot.lane.b32.xlu2 %v430_v3, %s1378_s8  ;;  %v530_v50 = vsel %vm469_vm2, %v528_v43, %v529_v44 }
  0x94   : > { %437 = vrot.lane.b32.xlu0 %v431_v47, %s1378_s8  ;;  %433 = vrot.lane.b32.xlu1 %v429_v48, %s1378_s8  ;;  %v756_v47 = vsel %vm692_vm3, %v754_v36, %v755_v37  ;;  %v1659_v48 = vld [vmem:[#allocation2 + $0x40] sm:$0x3] }
  0x95   : > { %v734_v51 = vmul.f32 %v722_v42, %v1659_v48 }
  0x96   : > { %656 = vrot.lane.b32.xlu2 %v652_v17, %s1378_s8 }
  0x97   : > { %v749_v55 = vrot.slane %v734_v51, 2 }
  0x9c   : > { %658 = vrot.lane.b32.xlu0 %v653_v54, %s1378_s8  ;;  %439 = vrot.lane.b32.xlu1 %v432_v57, %s1378_s8  ;;  %v748_v54 = vrot.slane %v730_v49, 2  ;;  %v1667_v57 = vld [vmem:[#allocation2 + $0x18] sm:$0xfc] }
  0x9d   : > { %v731_v60 = vmul.f32 %v723_v56, %v1667_v57 }
  0x9e   : > { %662 = vrot.lane.b32.xlu2 %v655_v31, %s1378_s8  ;;  %v750_v59 = vsel %vm692_vm3, %v748_v54, %v749_v55 }
  0x9f   : > { %v751_v0 = vrot.slane %v731_v60, 2 }
  0xa4   : > { %534 = vrot.lane.b32.xlu0 %v524_v1, %s1378_s8  ;;  %660 = vrot.lane.b32.xlu1 %v654_v4, %s1378_s8  ;;  %v752_v1 = vrot.slane %v735_v63, 2 }
  0xa6   : > { %538 = vrot.lane.b32.xlu2 %v530_v50, %s1378_s8  ;;  %v753_v2 = vsel %vm692_vm3, %v751_v0, %v752_v1 }
  0xac   : > { %540 = vrot.lane.b32.xlu0 %v533_v11, %s1378_s8  ;;  %536 = vrot.lane.b32.xlu1 %v527_v26, %s1378_s8 }
  0xae   : > { %761 = vrot.lane.b32.xlu2 %v753_v2, %s1378_s8 }
  0xb4   : > { %757 = vrot.lane.b32.xlu0 %v747_v32, %s1378_s8  ;;  %759 = vrot.lane.b32.xlu1 %v750_v59, %s1378_s8 }
  0xb8   : > { %v335_v46 = vpop.permute.xlu2 %334 }
  0xbc   : > { %763 = vrot.lane.b32.xlu0 %v756_v47, %s1378_s8 }
  0xc0   : > { %v337_v3 = vpop.permute.xlu2 %336 }
  0xc1   : > { %v342_v4 = vsel %vm296_vm4, %v335_v46, %v337_v3 }
  0xc8   : > { %v363_v5 = vpop.permute.xlu2 %362 }
  0xc9   : > { %v379_v6 = vmul.f32 %v363_v5, %v1561_v16 }
  0xcb   : > { %389 = vrot.lane.b32.xlu0 %v379_v6, %s1380_s17 }
  0xce   : > { %v293_v10 = vpop.permute.xlu1 %292  ;;  %v289_v11 = vpop.permute.xlu0 %288 }
  0xcf   : > { %v305_v12 = vmul.f32 %v289_v11, %v276_v7  ;;  %v419_v7 = vld [vmem:[#allocation2 + $0x28] sm:$0xfe] }
  0xd0   : > { %v369_v17 = vpop.permute.xlu2 %368 }
  0xd1   : > { %v1680_v18 = vadd.f32 %v335_v46, %v305_v12  ;;  %v383_v19 = vmul.f32 %v369_v17, %v281_v15 }
  0xd3   : > { %397 = vrot.lane.b32.xlu0 %v383_v19, %s1380_s17 }
  0xd6   : > { %v295_v20 = vpop.permute.xlu1 %294  ;;  %v291_v21 = vpop.permute.xlu0 %290 }
  0xd7   : > { %v299_v22 = vsel %vm296_vm4, %v293_v10, %v295_v20  ;;  %v297_v24 = vsel %vm296_vm4, %v289_v11, %v291_v21  ;;  %v298_v25 = vsel %vm296_vm4, %v291_v21, %v293_v10  ;;  %v309_v32 = vmul.f32 %v295_v20, %v1572_v27 }
  0xd8   : > { %v306_v26 = vmul.f32 %v297_v24, %v1561_v16  ;;  %v308_v33 = vmul.f32 %v299_v22, %v1574_v28  ;;  %v307_v34 = vmul.f32 %v298_v25, %v1567_v23  ;;  %v567_v51 = vpop.permute.xlu2 %566 }
  0xda   : > { %v1687_v31 = vadd.f32 %v342_v4, %v306_v26 }
  0xde   : > { %v341_v35 = vpop.permute.xlu1 %340  ;;  %v339_v36 = vpop.permute.xlu0 %338 }
  0xdf   : > { %v1692_v37 = vadd.f32 %v341_v35, %v309_v32  ;;  %v343_v40 = vsel %vm296_vm4, %v337_v3, %v339_v36  ;;  %v344_v41 = vsel %vm296_vm4, %v339_v36, %v341_v35 }
  0xe0   : > { %v1696_v42 = vadd.f32 %v343_v40, %v307_v34  ;;  %v1698_v43 = vadd.f32 %v344_v41, %v308_v33  ;;  %v788_v40 = vpop.permute.xlu2 %787 }
  0xe6   : > { %v367_v16 = vpop.permute.xlu1 %366  ;;  %v365_v44 = vpop.permute.xlu0 %364 }
  0xe7   : > { %v371_v46 = vsel %vm370_vm5, %v363_v5, %v365_v44  ;;  %v372_v47 = vsel %vm370_vm5, %v365_v44, %v367_v16  ;;  %v373_v54 = vsel %vm370_vm5, %v367_v16, %v369_v17 }
  0xe8   : > { %v380_v49 = vmul.f32 %v371_v46, %v1567_v23  ;;  %v381_v50 = vmul.f32 %v372_v47, %v1574_v28  ;;  %v382_v0 = vmul.f32 %v373_v54, %v1572_v27  ;;  %v425_v27 = vld [vmem:[#allocation2 + $0x58] sm:$0x1] }
  0xea   : > { %393 = vrot.lane.b32.xlu2 %v381_v50, %s1380_s17  ;;  %391 = vrot.lane.b32.xlu1 %v380_v49, %s1380_s17 }
  0xee   : > { %v565_v55 = vpop.permute.xlu1 %564  ;;  %v563_v56 = vpop.permute.xlu0 %562 }
  0xef   : > { %v578_v59 = vmul.f32 %v563_v56, %v1598_v52  ;;  %v583_v60 = vmul.f32 %v563_v56, %v1600_v53  ;;  %v571_v63 = vsel %vm370_vm5, %v565_v55, %v567_v51  ;;  %v570_v19 = vsel %vm370_vm5, %v563_v56, %v565_v55 }
  0xf0   : > { %v580_v23 = vmul.f32 %v571_v63, %v1649_v38  ;;  %v585_v28 = vmul.f32 %v571_v63, %v1651_v39  ;;  %v579_v32 = vmul.f32 %v570_v19, %v1627_v13  ;;  %v584_v36 = vmul.f32 %v570_v19, %v1629_v14  ;;  %v648_v19 = vld [vmem:[#allocation2 + $0x58] sm:$0x3] }
  0xf1   : > { %v598_v1 = vrot.slane %v578_v59, 1  ;;  %v599_v3 = vrot.slane %v583_v60, 1 }
  0xf2   : > { %v604_v4 = vrot.slane %v580_v23, 1  ;;  %v605_v2 = vrot.slane %v585_v28, 1  ;;  %395 = vrot.lane.b32.xlu2 %v382_v0, %s1380_s17  ;;  %v601_v46 = vrot.slane %v579_v32, 1 }
  0xf3   : > { %v600_v5 = vsel %vm469_vm2, %v598_v1, %v599_v3 }
  0xf4   : > { %613 = vrot.lane.b32.xlu1 %v600_v5, %s1380_s17  ;;  %v606_v6 = vsel %vm469_vm2, %v604_v4, %v605_v2  ;;  %v1743_v5 = vpop.permute.xlu2 %435 }
  0xf5   : > { %617 = vrot.lane.b32.xlu0 %v606_v6, %s1380_s17 }
  0xf6   : > { %v786_v10 = vpop.permute.xlu1 %785  ;;  %v569_v11 = vpop.permute.xlu0 %568 }
  0xf7   : > { %v801_v12 = vmul.f32 %v786_v10, %v1620_v8  ;;  %v806_v15 = vmul.f32 %v786_v10, %v1622_v9  ;;  %v582_v17 = vmul.f32 %v569_v11, %v419_v7  ;;  %v572_v20 = vsel %vm370_vm5, %v567_v51, %v569_v11  ;;  %v861_v7 = vld [vmem:[#allocation6 + $0x21] ss:$8 sm:$0xf] }
  0xf8   : > { %v587_v21 = vmul.f32 %v569_v11, %v425_v27  ;;  %v581_v33 = vmul.f32 %v572_v20, %v1607_v61  ;;  %v586_v34 = vmul.f32 %v572_v20, %v1609_v62  ;;  %v602_v51 = vrot.slane %v584_v36, 1 }
  0xf9   : > { %v821_v22 = vrot.slane %v801_v12, 2  ;;  %v822_v24 = vrot.slane %v806_v15, 2  ;;  %v610_v25 = vrot.slane %v582_v17, 1  ;;  %v793_v59 = vsel %vm370_vm5, %v786_v10, %v788_v40  ;;  %v642_v17 = vld [vmem:[#allocation2 + $0x28] sm:$0xfc] }
  0xfa   : > { %v611_v26 = vrot.slane %v587_v21, 1  ;;  %v607_v47 = vrot.slane %v581_v33, 1  ;;  %v608_v49 = vrot.slane %v586_v34, 1  ;;  %v802_v1 = vmul.f32 %v793_v59, %v1656_v45 }
  0xfb   : > { %v823_v35 = vsel %vm692_vm3, %v821_v22, %v822_v24  ;;  %v807_v3 = vmul.f32 %v793_v59, %v1659_v48  ;;  %v603_v4 = vsel %vm469_vm2, %v601_v46, %v602_v51  ;;  %v863_v20 = vperm.slane %v861_v7, 0 }
  0xfc   : > { %836 = vrot.lane.b32.xlu1 %v823_v35, %s1380_s17  ;;  %v612_v41 = vsel %vm469_vm2, %v610_v25, %v611_v26  ;;  %v609_v28 = vsel %vm469_vm2, %v607_v47, %v608_v49  ;;  %v824_v12 = vrot.slane %v802_v1, 2  ;;  %v1756_v32 = vpop.permute.xlu2 %656  ;;  %v864_v36 = vperm.slane %v861_v7, 1 }
  0xfd   : > { %621 = vrot.lane.b32.xlu2 %v612_v41, %s1380_s17  ;;  %v825_v15 = vrot.slane %v807_v3, 2 }
  0xfe   : > { %v792_v16 = vpop.permute.xlu1 %791  ;;  %v790_v44 = vpop.permute.xlu0 %789 }
  0xff   : > { %v794_v50 = vsel %vm370_vm5, %v788_v40, %v790_v44  ;;  %v795_v54 = vsel %vm370_vm5, %v790_v44, %v792_v16  ;;  %v805_v22 = vmul.f32 %v792_v16, %v642_v17  ;;  %v810_v24 = vmul.f32 %v792_v16, %v648_v19 }
 0x100   : > { %v803_v55 = vmul.f32 %v794_v50, %v1667_v57  ;;  %v808_v56 = vmul.f32 %v794_v50, %v1669_v58  ;;  %v804_v0 = vmul.f32 %v795_v54, %v1638_v29  ;;  %v809_v23 = vmul.f32 %v795_v54, %v1640_v30 }
 0x101   : > { %v826_v25 = vsel %vm692_vm3, %v824_v12, %v825_v15  ;;  %v833_v34 = vrot.slane %v805_v22, 2  ;;  %v834_v35 = vrot.slane %v810_v24, 2  ;;  %v866_v40 = vperm.slane %v861_v7, 3 }
 0x102   : > { %v827_v60 = vrot.slane %v803_v55, 2  ;;  %v828_v63 = vrot.slane %v808_v56, 2  ;;  %v830_v27 = vrot.slane %v804_v0, 2  ;;  %v831_v10 = vrot.slane %v809_v23, 2 }
 0x103   : > { %v835_v41 = vsel %vm692_vm3, %v833_v34, %v834_v35  ;;  %v865_v16 = vperm.slane %v861_v7, 2 }
 0x104   : > { %619 = vrot.lane.b32.xlu1 %v609_v28, %s1380_s17  ;;  %v829_v2 = vsel %vm692_vm3, %v827_v60, %v828_v63  ;;  %v832_v21 = vsel %vm692_vm3, %v830_v27, %v831_v10  ;;  %v1772_v47 = vpop.permute.xlu2 %662 }
 0x105   : > { %615 = vrot.lane.b32.xlu2 %v603_v4, %s1380_s17  ;;  %840 = vrot.lane.b32.xlu0 %v829_v2, %s1380_s17 }
 0x106   : > { %v438_v6 = vpop.permute.xlu0 %437  ;;  %v434_v49 = vpop.permute.xlu1 %433 }
 0x107   : > { %v442_v11 = vsel %vm296_vm4, %v1743_v5, %v438_v6 }
 0x108   : > { %v451_v24 = vmul.f32 %v442_v11, %v1627_v13 }
 0x10a   : > { %v476_v34 = vrot.slane %v451_v24, 1 }
 0x10c   : > { %842 = vrot.lane.b32.xlu1 %v832_v21, %s1380_s17  ;;  %v1776_v51 = vpop.permute.xlu2 %538  ;;  %v441_v21 = vsel %vm296_vm4, %v434_v49, %v1743_v5 }
 0x10d   : > { %838 = vrot.lane.b32.xlu2 %v826_v25, %s1380_s17  ;;  %867 = vrot.lane.b32.xlu0 %v863_v20, %s1378_s8  ;;  %v456_v25 = vmul.f32 %v442_v11, %v1629_v14 }
 0x10e   : > { %v1754_v26 = vpop.permute.xlu0 %658  ;;  %v440_v54 = vpop.permute.xlu1 %439 }
 0x10f   : > { %v1761_v33 = vsel %vm296_vm4, %v1756_v32, %v1754_v26  ;;  %v443_v63 = vsel %vm296_vm4, %v438_v6, %v440_v54  ;;  %v453_v28 = vmul.f32 %v440_v54, %v1607_v61  ;;  %v458_v3 = vmul.f32 %v440_v54, %v1609_v62 }
 0x110   : > { %v452_v23 = vmul.f32 %v443_v63, %v1649_v38  ;;  %v457_v1 = vmul.f32 %v443_v63, %v1651_v39  ;;  %v477_v35 = vrot.slane %v456_v25, 1 }
 0x111   : > { %v482_v27 = vrot.slane %v453_v28, 1  ;;  %v483_v10 = vrot.slane %v458_v3, 1  ;;  %v673_v28 = vmul.f32 %v1761_v33, %v1620_v8 }
 0x112   : > { %v479_v2 = vrot.slane %v452_v23, 1  ;;  %v480_v7 = vrot.slane %v457_v1, 1  ;;  %v478_v14 = vsel %vm469_vm2, %v476_v34, %v477_v35  ;;  %v414_v1 = vld [vmem:[#allocation2] sm:$0xfe]  ;;  %v643_v34 = vld [vmem:[#allocation2 + $0x30] sm:$0x3] }
 0x113   : > { %v484_v62 = vsel %vm469_vm2, %v482_v27, %v483_v10 }
 0x114   : > { %869 = vrot.lane.b32.xlu1 %v864_v36, %s1378_s8  ;;  %v1780_v56 = vpop.permute.xlu2 %761  ;;  %v481_v39 = vsel %vm469_vm2, %v479_v2, %v480_v7 }
 0x115   : > { %844 = vrot.lane.b32.xlu2 %v835_v41, %s1380_s17  ;;  %873 = vrot.lane.b32.xlu0 %v866_v40, %s1378_s8 }
 0x116   : > { %v1767_v44 = vpop.permute.xlu0 %534  ;;  %v1782_v59 = vpop.permute.xlu1 %660 }
 0x11d   : > { %871 = vrot.lane.b32.xlu2 %v865_v16, %s1378_s8 }
 0x11e   : > { %v1770_v46 = vpop.permute.xlu0 %540  ;;  %v537_v12 = vpop.permute.xlu1 %536 }
 0x11f   : > { %v542_v27 = vsel %vm296_vm4, %v1767_v44, %v537_v12  ;;  %v543_v8 = vsel %vm296_vm4, %v537_v12, %v1776_v51 }
 0x126   : > { %v1774_v50 = vpop.permute.xlu0 %757  ;;  %v1803_v22 = vpop.permute.xlu1 %759 }
 0x12e   : > { %v1778_v55 = vpop.permute.xlu0 %763 }
 0x13d   : > { %v1784_v60 = vpop.permute.xlu0 %389 }
 0x13e   : > { %v409_v24 = vadd.f32 %v1784_v60, %v1680_v18  ;;  %v681_v18 = vmul.f32 %v1772_v47, %v1640_v30 }
 0x144   : > { %v394_v0 = vpop.permute.xlu2 %393 }
 0x145   : > { %v398_v4 = vpop.permute.xlu0 %397 }
 0x14c   : > { %v396_v15 = vpop.permute.xlu2 %395 }
 0x14d   : > { %v402_v17 = vsel %vm399_vm6, %v394_v0, %v396_v15  ;;  %v403_v6 = vsel %vm399_vm6, %v396_v15, %v398_v4  ;;  %v449_v4 = vmul.f32 %v434_v49, %v414_v1 }
 0x14e   : > { %v412_v38 = vadd.f32 %v402_v17, %v1698_v43  ;;  %v413_v61 = vadd.f32 %v403_v6, %v1692_v37  ;;  %v450_v43 = vmul.f32 %v441_v21, %v1598_v52  ;;  %v455_v37 = vmul.f32 %v441_v21, %v1600_v53 }
 0x14f   : > { %v665_v52 = vsel %vm296_vm4, %v1754_v26, %v1782_v59  ;;  %v696_v26 = vrot.slane %v673_v28, 2 }
 0x150   : > { %v1797_v19 = vadd.f32 %v481_v39, %v412_v38  ;;  %v1799_v20 = vadd.f32 %v484_v62, %v413_v61  ;;  %v473_v36 = vrot.slane %v450_v43, 1  ;;  %v474_v40 = vrot.slane %v455_v37, 1  ;;  %v637_v37 = vld [vmem:[#allocation2] sm:$0xfc] }
 0x151   : > { %v679_v3 = vmul.f32 %v665_v52, %v1659_v48  ;;  %v470_v39 = vrot.slane %v449_v4, 1 }
 0x152   : > { %v475_v53 = vsel %vm469_vm2, %v473_v36, %v474_v40 }
 0x153   : > { %v700_v15 = vrot.slane %v679_v3, 2 }
 0x157   : > { %v622_v41 = vpop.permute.xlu2 %621 }
 0x15c   : > { %v392_v16 = vpop.permute.xlu1 %391 }
 0x15d   : > { %v400_v54 = vsel %vm399_vm6, %v1784_v60, %v392_v16  ;;  %v401_v5 = vsel %vm399_vm6, %v392_v16, %v394_v0  ;;  %v678_v0 = vmul.f32 %v1761_v33, %v1622_v9  ;;  %v672_v16 = vmul.f32 %v1756_v32, %v637_v37 }
 0x15e   : > { %v410_v63 = vadd.f32 %v400_v54, %v1687_v31  ;;  %v411_v13 = vadd.f32 %v401_v5, %v1696_v42  ;;  %v420_v31 = vld [vmem:[#allocation2 + $0x30] sm:$0x1]  ;;  %v674_v42 = vmul.f32 %v665_v52, %v1656_v45  ;;  %v677_v54 = vmul.f32 %v1756_v32, %v643_v34 }
 0x15f   : > { %v697_v2 = vrot.slane %v678_v0, 2  ;;  %v454_v7 = vmul.f32 %v434_v49, %v420_v31  ;;  %v616_v17 = vpop.permute.xlu2 %615  ;;  %v676_v5 = vmul.f32 %v1772_v47, %v1638_v29  ;;  %v554_v32 = vadd.f32 %v1770_v46, %v1799_v20 }
 0x160   : > { %v491_v11 = vadd.f32 %v475_v53, %v410_v63  ;;  %v492_v23 = vadd.f32 %v478_v14, %v411_v13  ;;  %v699_v10 = vrot.slane %v674_v42, 2  ;;  %v693_v13 = vrot.slane %v672_v16, 2 }
 0x161   : > { %v471_v49 = vrot.slane %v454_v7, 1  ;;  %v698_v62 = vsel %vm692_vm3, %v696_v26, %v697_v2  ;;  %v694_v52 = vrot.slane %v677_v54, 2  ;;  %v705_v14 = vrot.slane %v676_v5, 2 }
 0x162   : > { %v551_v33 = vadd.f32 %v542_v27, %v491_v11  ;;  %v552_v38 = vadd.f32 %v543_v8, %v492_v23  ;;  %v701_v12 = vsel %vm692_vm3, %v699_v10, %v700_v15  ;;  %v706_v11 = vrot.slane %v681_v18, 2 }
 0x163   : > { %v472_v35 = vsel %vm469_vm2, %v470_v39, %v471_v49  ;;  %v666_v23 = vsel %vm296_vm4, %v1782_v59, %v1772_v47  ;;  %v695_v29 = vsel %vm692_vm3, %v693_v13, %v694_v52  ;;  %v544_v47 = vsel %vm296_vm4, %v1776_v51, %v1770_v46 }
 0x164   : > { %v490_v36 = vadd.f32 %v472_v35, %v409_v24  ;;  %v680_v1 = vmul.f32 %v666_v23, %v1669_v58  ;;  %v707_v3 = vsel %vm692_vm3, %v705_v14, %v706_v11  ;;  %v553_v4 = vadd.f32 %v544_v47, %v1797_v19 }
 0x165   : > { %v765_v46 = vsel %vm296_vm4, %v1774_v50, %v1803_v22  ;;  %v766_v51 = vsel %vm296_vm4, %v1803_v22, %v1780_v56 }
 0x166   : > { %v614_v9 = vpop.permute.xlu1 %613  ;;  %v550_v60 = vadd.f32 %v1767_v44, %v490_v36  ;;  %v675_v44 = vmul.f32 %v666_v23, %v1667_v57 }
 0x167   : > { %v623_v6 = vsel %vm399_vm6, %v614_v9, %v616_v17  ;;  %v618_v45 = vpop.permute.xlu0 %617  ;;  %v839_v63 = vpop.permute.xlu2 %838 }
 0x168   : > { %v633_v48 = vadd.f32 %v623_v6, %v551_v33  ;;  %v624_v61 = vsel %vm399_vm6, %v616_v17, %v618_v45  ;;  %v632_v53 = vadd.f32 %v614_v9, %v550_v60  ;;  %v702_v26 = vrot.slane %v675_v44, 2 }
 0x169   : > { %v634_v21 = vadd.f32 %v624_v61, %v552_v38  ;;  %v767_v33 = vsel %vm296_vm4, %v1780_v56, %v1778_v55 }
 0x16a   : > { %v714_v25 = vadd.f32 %v698_v62, %v633_v48  ;;  %v713_v31 = vadd.f32 %v695_v29, %v632_v53 }
 0x16b   : > { %v715_v43 = vadd.f32 %v701_v12, %v634_v21 }
 0x16c   : > { %v773_v2 = vadd.f32 %v1774_v50, %v713_v31  ;;  %v774_v6 = vadd.f32 %v765_v46, %v714_v25 }
 0x16e   : > { %v837_v40 = vpop.permute.xlu1 %836 }
 0x16f   : > { %v845_v57 = vpop.permute.xlu2 %844  ;;  %v855_v58 = vadd.f32 %v837_v40, %v773_v2  ;;  %v846_v19 = vsel %vm399_vm6, %v837_v40, %v839_v63 }
 0x170   : > { %v856_v39 = vadd.f32 %v846_v19, %v774_v6 }
 0x176   : > { %v620_v28 = vpop.permute.xlu1 %619 }
 0x177   : > { %v626_v30 = vsel %vm399_vm6, %v620_v28, %v622_v41  ;;  %v841_v0 = vpop.permute.xlu0 %840  ;;  %v625_v59 = vsel %vm399_vm6, %v618_v45, %v620_v28  ;;  %v703_v41 = vrot.slane %v680_v1, 2  ;;  %v775_v45 = vadd.f32 %v766_v51, %v715_v43  ;;  %v872_v48 = vpop.permute.xlu2 %871 }
 0x178   : > { %v636_v42 = vadd.f32 %v626_v30, %v554_v32  ;;  %v635_v7 = vadd.f32 %v625_v59, %v553_v4  ;;  %v847_v9 = vsel %vm399_vm6, %v839_v63, %v841_v0 }
 0x179   : > { %v704_v15 = vsel %vm692_vm3, %v702_v26, %v703_v41  ;;  %v857_v50 = vadd.f32 %v847_v9, %v775_v45 }
 0x17a   : > { %v717_v20 = vadd.f32 %v707_v3, %v636_v42  ;;  %v716_v17 = vadd.f32 %v704_v15, %v635_v7 }
 0x17c   : > { %v776_v61 = vadd.f32 %v767_v33, %v716_v17  ;;  %v777_v34 = vadd.f32 %v1778_v55, %v717_v20 }
 0x17e   : > { %v843_v27 = vpop.permute.xlu1 %842 }
 0x17f   : > { %v868_v10 = vpop.permute.xlu0 %867  ;;  %v848_v38 = vsel %vm399_vm6, %v841_v0, %v843_v27  ;;  %v849_v43 = vsel %vm399_vm6, %v843_v27, %v845_v57 }
 0x180   : > { %v883_v8 = vadd.f32 %v868_v10, %v855_v58  ;;  %v858_v62 = vadd.f32 %v848_v38, %v776_v61  ;;  %v859_v35 = vadd.f32 %v849_v43, %v777_v34 }
 0x182   : > { %893 = vrot.lane.b32.xlu1 %v883_v8, %s1379_s25 }
 0x186   : > { %v870_v49 = vpop.permute.xlu1 %869 }
 0x187   : > { %v875_v22 = vsel %vm296_vm4, %v868_v10, %v870_v49  ;;  %v876_v21 = vsel %vm296_vm4, %v870_v49, %v872_v48  ;;  %v874_v24 = vpop.permute.xlu0 %873 }
 0x188   : > { %v884_v12 = vadd.f32 %v875_v22, %v856_v39  ;;  %v885_v37 = vadd.f32 %v876_v21, %v857_v50  ;;  %v877_v56 = vsel %vm296_vm4, %v872_v48, %v874_v24  ;;  %v887_v36 = vadd.f32 %v874_v24, %v859_v35 }
 0x189   : > { %v886_v25 = vadd.f32 %v877_v56, %v858_v62 }
 0x18a   : > { %897 = vrot.lane.b32.xlu0 %v885_v37, %s1379_s25  ;;  %895 = vrot.lane.b32.xlu2 %v884_v12, %s1379_s25 }
 0x18b   : > { %899 = vrot.lane.b32.xlu1 %v886_v25, %s1379_s25 }
 0x192   : > { %901 = vrot.lane.b32.xlu2 %v887_v36, %s1379_s25 }
 0x1e4   : > { %v896_v40 = vpop.permute.xlu2 %895 }
 0x1ec   : > { %v902_v5 = vpop.permute.xlu2 %901 }
 0x1f4   : > { %v894_v16 = vpop.permute.xlu1 %893 }
 0x1f5   : > { %v903_v54 = vsel %vm370_vm5, %v894_v16, %v896_v40 }
 0x1f6   : > { %911 = vst [vmem:[%s1553_s7] sm:$0xff] %v903_v54 }
 0x1fc   : > { %v898_v55 = vpop.permute.xlu0 %897 }
 0x1fd   : > { %v904_v18 = vsel %vm370_vm5, %v896_v40, %v898_v55  ;;  %v900_v60 = vpop.permute.xlu1 %899 }
 0x1fe   : > { %912 = vst [vmem:[%s1553_s7 + $0x8] sm:$0xff] %v904_v18  ;;  %v905_v63 = vsel %vm370_vm5, %v898_v55, %v900_v60  ;;  %v906_v13 = vsel %vm370_vm5, %v900_v60, %v902_v5 }
 0x1ff   : > { %913 = vst [vmem:[%s1553_s7 + $0x10] sm:$0xff] %v905_v63 }
 0x200   : > { %914 = vst [vmem:[%s1553_s7 + $0x18] sm:$0xff] %v906_v13 }
 0x201   : > { %1273 = shalt.err (!%p1270_p8)
}
 0x202   : > { %1073 = dma.vmem_to_hbm [thread:$0]  (%p1466_p6), %s932_s28, 512, %s934_s30, %s916_s15  }
 0x203 PF: > { %s1974_s9 = sld [smem:[#allocation12_spill]]  ;;  %p1090_p9 = scmp.ge.s32.totalorder %s1372_s19, 2 }
 0x205   : > { %p1084_p12 = pnand %p1090_p9, %p1472_p10 }
 0x207   : > { %p1085_p13 = pneg %p1084_p12 }
 0x209   : > { %s945_s17 = sand.u32 1, %s1974_s9  }
 0x20a   : > { %s946_s24 = scalar_lea.sflag [#allocation5], %s945_s17 }
 0x20b   : > { %1327 = dma.done.wait (%p1085_p13), %s946_s24, 512  }
 0x20c   : > { %1329 = vsyncadd (%p1085_p13), %s946_s24, 4294966784  ;;  %s19_s19 = sadd.s32 1, %s1372_s19   ;;  %s1976_s15 = sld [smem:[#allocation13_spill]] }
 0x20d   : > { %p16_p1 = scmp.ge.s32.totalorder %s19_s19, 6   ;;  %s1977_s17 = sld [smem:[#allocation16_spill]] }
 0x20e   : > { %s1978_s23 = sld [smem:[#allocation17_spill]]  ;;  %s1979_s9 = smov %s1336_s10 }
 0x20f   : > { %s1980_s10 = smov %s1340_s11  ;;  %s1981_s11 = smov %s1517_s5 }
 0x210   : > { %s1982_s12 = smov %s1348_s13  ;;  %s1983_s13 = smov %s1352_s14 }
 0x211   : > { %s1984_s14 = smov %s1514_s4  ;;  %s1985_s16 = smov %s1368_s18 }
 0x212   :  { %18 = sbr.rel (!%p16_p1) target bundleno = 12 (0xc), region = 99 }
 0x214   : > { %s1986_s18 = smov %s1978_s23 }
 0x217   :  { %952 = vsyncpa [#allocation4], 1 }
 0x218   :  { %954 = vsyncpa [#allocation4 + $0x1], 1 }
 0x219   :  { %955 = vsyncpa [#allocation7], 1 }
 0x21a   :  { %956 = vsyncpa [#allocation5], 1 }
 0x21b   :  { %958 = vsyncpa [#allocation5 + $0x1], 1 }

</bundles_post_ra>
